<compile_context>
chip_gen: v7x
topology: tpu7x:2x2x1
jax: 0.10.0
libtpu: 0.0.40
codegen_flags: <defaults>
</compile_context>

<pallas_src>
import functools

import jax
import jax.numpy as jnp
from jax.experimental import pallas as pl
from jax.experimental.pallas import tpu as pltpu

IN_DIM = 32 * 32 * 3   # 3072
H1 = 64
H2 = 32
OUT = 10
OUT_PAD = 128          # lane-dense output slab (>= OUT, multiple of 128)
MAX_TB = 512           # batch tile cap: 512*3072*4B = 6 MiB f32 x tile


def mlp_kernel(x_ref, w1_ref, b1_ref, w2_ref, b2_ref, w3_ref, b3_ref, o_ref):
    # Layer 1: cast the f32 tile to bf16 on the VPU (free under the DMA-bound
    # regime), bf16 [TB,3072] @ bf16 [3072,64] on the MXU with f32 accumulate.
    x_bf16 = x_ref[...].astype(jnp.bfloat16)
    h1 = jnp.dot(x_bf16, w1_ref[...], preferred_element_type=jnp.float32)
    h1 = jnp.maximum(h1 + b1_ref[...], 0.0)
    # Layer 2: f32 [TB, 64] @ [64, 32] + bias, ReLU
    h2 = jnp.dot(h1, w2_ref[...], preferred_element_type=jnp.float32)
    h2 = jnp.maximum(h2 + b2_ref[...], 0.0)
    # Layer 3: f32 [TB, 32] @ [32, 128] + bias (cols >= OUT are zero-padded)
    out = jnp.dot(h2, w3_ref[...], preferred_element_type=jnp.float32)
    o_ref[...] = (out + b3_ref[...]).astype(o_ref.dtype)   # bf16 store


def prepare_params(w1, b1, w2, b2, w3, b3):
    """One-time parameter prep (outside the jitted forward):
    transpose to [in, out], cast layer-1 weight to bf16, pad layer-3 to 128 lanes."""
    w1t = w1.T.astype(jnp.bfloat16)                                      # [3072, 64] bf16
    b1r = b1[None, :].astype(jnp.float32)                                # [1, 64]
    w2t = w2.T.astype(jnp.float32)                                       # [64, 32]
    b2r = b2[None, :].astype(jnp.float32)                                # [1, 32]
    w3t = jnp.zeros((H2, OUT_PAD), jnp.float32).at[:, :OUT].set(w3.T)    # [32, 128]
    b3r = jnp.zeros((1, OUT_PAD), jnp.float32).at[:, :OUT].set(b3)       # [1, 128]
    return w1t, b1r, w2t, b2r, w3t, b3r


@functools.partial(jax.jit, static_argnames=("tb",))
def _mlp_forward(x_nchw, w1t, b1r, w2t, b2r, w3t, b3r, *, tb):
    B = x_nchw.shape[0]
    # nn.Flatten: [B, C, H, W] -> [B, C*H*W]; stays f32 (cast happens in-kernel).
    x = x_nchw.reshape(B, -1)

    grid = (pl.cdiv(B, tb),)   # ragged last block handled by Pallas (no jnp.pad)
    out = pl.pallas_call(
        mlp_kernel,
        out_shape=jax.ShapeDtypeStruct((B, OUT_PAD), jnp.bfloat16),
        grid_spec=pltpu.PrefetchScalarGridSpec(
            num_scalar_prefetch=0,
            grid=grid,
            in_specs=[
                pl.BlockSpec((tb, IN_DIM),   lambda i: (i, 0)),  # x tile (f32)
                pl.BlockSpec((IN_DIM, H1),   lambda i: (0, 0)),  # w1 (bf16)
                pl.BlockSpec((1, H1),        lambda i: (0, 0)),  # b1
                pl.BlockSpec((H1, H2),       lambda i: (0, 0)),  # w2
                pl.BlockSpec((1, H2),        lambda i: (0, 0)),  # b2
                pl.BlockSpec((H2, OUT_PAD),  lambda i: (0, 0)),  # w3 (padded)
                pl.BlockSpec((1, OUT_PAD),   lambda i: (0, 0)),  # b3 (padded)
            ],
            out_specs=pl.BlockSpec((tb, OUT_PAD), lambda i: (i, 0)),
        ),
        compiler_params=pltpu.CompilerParams(
            dimension_semantics=("parallel",),   # batch tiles shard across TCs (v7x)
            vmem_limit_bytes=32 << 20,           # holds 512-row f32 double-buffer on v5e/v6e/v7x
        ),
    )(x, w1t, b1r, w2t, b2r, w3t, b3r)

    # Tiny (B, 10) slice; cast back to f32 to match the PyTorch module's output.
    return out[:, :OUT].astype(jnp.float32)


def _round_up(n, m):
    return ((n + m - 1) // m) * m


def _choose_tb(B):
    """Batch-tile heuristic:
       - small batches: round up to 16 rows (bf16 output sublane packing),
       - large batches: balanced tiles, even tile count >= 2 so both v7x
         TensorCores get work under the parallel grid axis."""
    if B <= MAX_TB:
        return min(MAX_TB, max(16, _round_up(B, 16)))
    n_tiles = -(-B // MAX_TB)          # cdiv
    if n_tiles % 2:
        n_tiles += 1                   # even number of tiles for the 2 TCs
    tb = _round_up(-(-B // n_tiles), 16)
    return min(MAX_TB, max(16, tb))


def mlp_forward(x_nchw, prepared_params, tb=None):
    """Forward pass. `prepared_params` comes from prepare_params()."""
    if tb is None:
        tb = _choose_tb(x_nchw.shape[0])
    return _mlp_forward(x_nchw, *prepared_params, tb=tb)


def init_params(key):
    """Deterministic init mimicking PyTorch nn.Linear defaults
    (uniform in [-1/sqrt(fan_in), 1/sqrt(fan_in)]), stored PyTorch-style
    as (w [out, in], b [out])."""
    ks = jax.random.split(key, 6)

    def linear(kw, kb, fan_in, fan_out):
        bound = 1.0 / jnp.sqrt(fan_in)
        w = jax.random.uniform(kw, (fan_out, fan_in), jnp.float32, -bound, bound)
        b = jax.random.uniform(kb, (fan_out,), jnp.float32, -bound, bound)
        return w, b

    w1, b1 = linear(ks[0], ks[1], IN_DIM, H1)
    w2, b2 = linear(ks[2], ks[3], H1, H2)
    w3, b3 = linear(ks[4], ks[5], H2, OUT)
    return w1, b1, w2, b2, w3, b3


if __name__ == "__main__":
    key = jax.random.PRNGKey(0)
    k_x, k_p = jax.random.split(key)

    # Small CIFAR-like input consistent with the module: [B, 3, 32, 32]
    x = jax.random.normal(k_x, (2, 3, 32, 32), dtype=jnp.float32)
    params = init_params(k_p)
    prepared = prepare_params(*params)

    out = mlp_forward(x, prepared)
    out = jax.block_until_ready(out)

    # Pure-JAX f32 reference of the same math (kernel uses bf16 for layer-1
    # operands and the output store, so the tolerance is loosened accordingly).
    w1, b1, w2, b2, w3, b3 = params
    xf = x.reshape(x.shape[0], -1)
    ref = jnp.maximum(xf @ w1.T + b1, 0.0)
    ref = jnp.maximum(ref @ w2.T + b2, 0.0)
    ref = ref @ w3.T + b3
    assert out.shape == (2, 10)
    assert jnp.allclose(out, ref, atol=3e-2, rtol=3e-2), (
        f"max abs err {jnp.max(jnp.abs(out - ref))}")

    print("KERNEL_OK")
</pallas_src>

<mosaic_0001>
module attributes {stable_mosaic.version = 11 : i64} {
  func.func @mlp_kernel(%arg0: i32, %arg1: memref<16x3072xf32, #tpu.memory_space<vmem>>, %arg2: memref<3072x64xbf16, #tpu.memory_space<vmem>>, %arg3: memref<1x64xf32, #tpu.memory_space<vmem>>, %arg4: memref<64x32xf32, #tpu.memory_space<vmem>>, %arg5: memref<1x32xf32, #tpu.memory_space<vmem>>, %arg6: memref<32x128xf32, #tpu.memory_space<vmem>>, %arg7: memref<1x128xf32, #tpu.memory_space<vmem>>, %arg8: memref<16x128xbf16, #tpu.memory_space<vmem>>) attributes {dimension_semantics = [#tpu.dimension_semantics<parallel>], iteration_bounds = array<i64: 1>, scalar_prefetch = 0 : i64, scratch_operands = 0 : i64, tpu.core_type = #tpu.core_type<tc>, window_params = [{transform_indices = @transform_0, window_bounds = array<i64: 16, 3072>}, {pipeline_mode = #tpu.pipeline_mode<synchronous>, transform_indices = @transform_1, window_bounds = array<i64: 3072, 64>}, {pipeline_mode = #tpu.pipeline_mode<synchronous>, transform_indices = @transform_2, window_bounds = array<i64: 1, 64>}, {pipeline_mode = #tpu.pipeline_mode<synchronous>, transform_indices = @transform_3, window_bounds = array<i64: 64, 32>}, {pipeline_mode = #tpu.pipeline_mode<synchronous>, transform_indices = @transform_4, window_bounds = array<i64: 1, 32>}, {pipeline_mode = #tpu.pipeline_mode<synchronous>, transform_indices = @transform_5, window_bounds = array<i64: 32, 128>}, {pipeline_mode = #tpu.pipeline_mode<synchronous>, transform_indices = @transform_6, window_bounds = array<i64: 1, 128>}, {transform_indices = @transform_7, window_bounds = array<i64: 16, 128>}]} {
    %c0 = arith.constant 0 : index
    %c0_0 = arith.constant 0 : index
    %0 = vector.load %arg1[%c0, %c0_0] : memref<16x3072xf32, #tpu.memory_space<vmem>>, vector<16x3072xf32>
    %1 = arith.truncf %0 : vector<16x3072xf32> to vector<16x3072xbf16>
    %c0_1 = arith.constant 0 : index
    %c0_2 = arith.constant 0 : index
    %2 = vector.load %arg2[%c0_1, %c0_2] : memref<3072x64xbf16, #tpu.memory_space<vmem>>, vector<3072x64xbf16>
    %cst = arith.constant dense<0.000000e+00> : vector<16x64xf32>
    %3 = tpu.matmul %1, %2, %cst {dimension_numbers = #tpu.dot_dimension_numbers<[1], [0], [0], [1], [0, 0, 1, 1], [], []>} : vector<16x3072xbf16>, vector<3072x64xbf16>, vector<16x64xf32> -> vector<16x64xf32>
    %c0_3 = arith.constant 0 : index
    %c0_4 = arith.constant 0 : index
    %4 = vector.load %arg3[%c0_3, %c0_4] : memref<1x64xf32, #tpu.memory_space<vmem>>, vector<1x64xf32>
    %5 = vector.broadcast %4 : vector<1x64xf32> to vector<16x64xf32>
    %6 = arith.addf %3, %5 : vector<16x64xf32>
    %cst_5 = arith.constant 0.000000e+00 : f32
    %7 = vector.broadcast %cst_5 : f32 to vector<16x64xf32>
    %8 = arith.maximumf %6, %7 : vector<16x64xf32>
    %c0_6 = arith.constant 0 : index
    %c0_7 = arith.constant 0 : index
    %9 = vector.load %arg4[%c0_6, %c0_7] : memref<64x32xf32, #tpu.memory_space<vmem>>, vector<64x32xf32>
    %cst_8 = arith.constant dense<0.000000e+00> : vector<16x32xf32>
    %10 = tpu.matmul %8, %9, %cst_8 {dimension_numbers = #tpu.dot_dimension_numbers<[1], [0], [0], [1], [0, 0, 1, 1], [], []>} : vector<16x64xf32>, vector<64x32xf32>, vector<16x32xf32> -> vector<16x32xf32>
    %c0_9 = arith.constant 0 : index
    %c0_10 = arith.constant 0 : index
    %11 = vector.load %arg5[%c0_9, %c0_10] : memref<1x32xf32, #tpu.memory_space<vmem>>, vector<1x32xf32>
    %12 = vector.broadcast %11 : vector<1x32xf32> to vector<16x32xf32>
    %13 = arith.addf %10, %12 : vector<16x32xf32>
    %cst_11 = arith.constant 0.000000e+00 : f32
    %14 = vector.broadcast %cst_11 : f32 to vector<16x32xf32>
    %15 = arith.maximumf %13, %14 : vector<16x32xf32>
    %c0_12 = arith.constant 0 : index
    %c0_13 = arith.constant 0 : index
    %16 = vector.load %arg6[%c0_12, %c0_13] : memref<32x128xf32, #tpu.memory_space<vmem>>, vector<32x128xf32>
    %cst_14 = arith.constant dense<0.000000e+00> : vector<16x128xf32>
    %17 = tpu.matmul %15, %16, %cst_14 {dimension_numbers = #tpu.dot_dimension_numbers<[1], [0], [0], [1], [0, 0, 1, 1], [], []>} : vector<16x32xf32>, vector<32x128xf32>, vector<16x128xf32> -> vector<16x128xf32>
    %c0_15 = arith.constant 0 : index
    %c0_16 = arith.constant 0 : index
    %18 = vector.load %arg7[%c0_15, %c0_16] : memref<1x128xf32, #tpu.memory_space<vmem>>, vector<1x128xf32>
    %19 = vector.broadcast %18 : vector<1x128xf32> to vector<16x128xf32>
    %20 = arith.addf %17, %19 : vector<16x128xf32>
    %21 = arith.truncf %20 : vector<16x128xf32> to vector<16x128xbf16>
    %c0_17 = arith.constant 0 : index
    %c0_18 = arith.constant 0 : index
    %22 = vector.load %arg8[%c0_17, %c0_18] : memref<16x128xbf16, #tpu.memory_space<vmem>>, vector<16x128xbf16>
    tpu.vector_store %arg8[%c0_17, %c0_18], %21 {strides = array<i32>} : memref<16x128xbf16, #tpu.memory_space<vmem>>, vector<16x128xbf16>,
    return
  }
  func.func @transform_0(%arg0: i32) -> (i32, i32) {
    %c0_i32 = arith.constant 0 : i32
    %c0_i32_0 = arith.constant 0 : i32
    return %arg0, %c0_i32 : i32, i32
  }
  func.func @transform_1(%arg0: i32) -> (i32, i32) {
    %c0_i32 = arith.constant 0 : i32
    %c0_i32_0 = arith.constant 0 : i32
    %c0_i32_1 = arith.constant 0 : i32
    return %c0_i32, %c0_i32_0 : i32, i32
  }
  func.func @transform_2(%arg0: i32) -> (i32, i32) {
    %c0_i32 = arith.constant 0 : i32
    %c0_i32_0 = arith.constant 0 : i32
    %c0_i32_1 = arith.constant 0 : i32
    return %c0_i32, %c0_i32_0 : i32, i32
  }
  func.func @transform_3(%arg0: i32) -> (i32, i32) {
    %c0_i32 = arith.constant 0 : i32
    %c0_i32_0 = arith.constant 0 : i32
    %c0_i32_1 = arith.constant 0 : i32
    return %c0_i32, %c0_i32_0 : i32, i32
  }
  func.func @transform_4(%arg0: i32) -> (i32, i32) {
    %c0_i32 = arith.constant 0 : i32
    %c0_i32_0 = arith.constant 0 : i32
    %c0_i32_1 = arith.constant 0 : i32
    return %c0_i32, %c0_i32_0 : i32, i32
  }
  func.func @transform_5(%arg0: i32) -> (i32, i32) {
    %c0_i32 = arith.constant 0 : i32
    %c0_i32_0 = arith.constant 0 : i32
    %c0_i32_1 = arith.constant 0 : i32
    return %c0_i32, %c0_i32_0 : i32, i32
  }
  func.func @transform_6(%arg0: i32) -> (i32, i32) {
    %c0_i32 = arith.constant 0 : i32
    %c0_i32_0 = arith.constant 0 : i32
    %c0_i32_1 = arith.constant 0 : i32
    return %c0_i32, %c0_i32_0 : i32, i32
  }
  func.func @transform_7(%arg0: i32) -> (i32, i32) {
    %c0_i32 = arith.constant 0 : i32
    %c0_i32_0 = arith.constant 0 : i32
    return %arg0, %c0_i32 : i32, i32
  }
}

</mosaic_0001>

<bundles_post_ra>
// kernel: _mlp_forward.1
= control target key start
LH: loop header
LB: loop body
LE: loop exit
PB: predicated region body
PF: predicated region fallthrough
CT: control target
= control target key end

     0   :  { %v130_v30 = vlaneseq  ;;  %v3766_v33 = vmov 1983009808   ;;  %vm2679_vm0 = vcmask 523264   ;;  %vm2774_vm1 = vcmask 261120   ;;  %s4630_s0 = inlined_call_operand.vmem [shape: f32[2,3072], index: 0, kind: input, shape index: {}]   ;;  %s4631_s1 = inlined_call_operand.vmem [shape: bf16[3072,64], index: 1, kind: input, shape index: {}]   ;;  %s4632_s2 = inlined_call_operand.vmem [shape: f32[1,64], index: 2, kind: input, shape index: {}]   ;;  %s4633_s3 = inlined_call_operand.vmem [shape: f32[64,32], index: 3, kind: input, shape index: {}]   ;;  %s4634_s4 = inlined_call_operand.vmem [shape: f32[1,32], index: 4, kind: input, shape index: {}]   ;;  %s4635_s5 = inlined_call_operand.vmem [shape: f32[32,128], index: 5, kind: input, shape index: {}]   ;;  %s4636_s6 = inlined_call_operand.vmem [shape: f32[1,128], index: 6, kind: input, shape index: {}]   ;;  %s4637_s7 = inlined_call_operand.vmem [shape: bf16[2,128], index: 7, kind: output, shape index: {}]  }
   0x1   :  { %v3502_v0 = vld [vmem:[%s4631_s1 + $0x40] sm:$0xff]   ;;  %v3506_v4 = vld [vmem:[%s4631_s1 + $0x48] sm:$0xff]   ;;  %v3510_v8 = vld [vmem:[%s4631_s1 + $0x50] sm:$0xff]   ;;  %v128_v34 = vunpack.c.l.s4 %v3766_v33 }
   0x2   :  { %v3503_v1 = vld [vmem:[%s4631_s1 + $0xc0] sm:$0xff]   ;;  %3166 = vmatprep.subr.bf16.mxu0 %v3502_v0  ;;  %v3507_v5 = vld [vmem:[%s4631_s1 + $0xc8] sm:$0xff]   ;;  %v3511_v9 = vld [vmem:[%s4631_s1 + $0xd0] sm:$0xff]   ;;  %v3904_v35 = vshrl.u32 %v130_v30, 7 }
   0x3   :  { %v3504_v2 = vld [vmem:[%s4631_s1] sm:$0xff]   ;;  %3188 = vmatprep.subr.bf16.mxu1 %v3503_v1  ;;  %v3508_v6 = vld [vmem:[%s4631_s1 + $0x8] sm:$0xff]   ;;  %v3512_v10 = vld [vmem:[%s4631_s1 + $0x10] sm:$0xff]   ;;  %v129_v38 = vunpack.c.0.s8 %v128_v34 }
   0x4   :  { %v3505_v3 = vld [vmem:[%s4631_s1 + $0x80] sm:$0xff]   ;;  %3167 = vmatpush3.bf16.msra.mxu0 %v3504_v2  ;;  %v3509_v7 = vld [vmem:[%s4631_s1 + $0x88] sm:$0xff]   ;;  %v3513_v11 = vld [vmem:[%s4631_s1 + $0x90] sm:$0xff]  }
   0x5   :  { %3189 = vmatpush3.bf16.msra.mxu1 %v3505_v3  ;;  %3168 = vmatprep.subr.bf16.mxu0 %v3506_v4  ;;  %v3514_v12 = vld [vmem:[%s4631_s1 + $0x58] sm:$0xff]   ;;  %v3518_v16 = vld [vmem:[%s4631_s1 + $0x60] sm:$0xff]   ;;  %v3522_v20 = vld [vmem:[%s4631_s1 + $0x68] sm:$0xff]   ;;  %v3928_v44 = vsub.s32 %v129_v38, %v3904_v35 }
   0x6   :  { %3190 = vmatprep.subr.bf16.mxu1 %v3507_v5  ;;  %v3515_v13 = vld [vmem:[%s4631_s1 + $0xd8] sm:$0xff]   ;;  %v3519_v17 = vld [vmem:[%s4631_s1 + $0xe0] sm:$0xff]   ;;  %v3523_v21 = vld [vmem:[%s4631_s1 + $0xe8] sm:$0xff]  }
   0x7   :  { %v3516_v14 = vld [vmem:[%s4631_s1 + $0x18] sm:$0xff]   ;;  %v3520_v18 = vld [vmem:[%s4631_s1 + $0x20] sm:$0xff]   ;;  %v3524_v22 = vld [vmem:[%s4631_s1 + $0x28] sm:$0xff]  }
   0x8   :  { %3169 = vmatpush3.bf16.msra.mxu0 %v3508_v6  ;;  %v3517_v15 = vld [vmem:[%s4631_s1 + $0x98] sm:$0xff]   ;;  %v3521_v19 = vld [vmem:[%s4631_s1 + $0xa0] sm:$0xff]   ;;  %v3525_v23 = vld [vmem:[%s4631_s1 + $0xa8] sm:$0xff]  }
   0x9   :  { %3191 = vmatpush3.bf16.msra.mxu1 %v3509_v7  ;;  %3170 = vmatprep.subr.bf16.mxu0 %v3510_v8  ;;  %v3526_v24 = vld [vmem:[%s4631_s1 + $0x70] sm:$0xff]   ;;  %v3530_v28 = vld [vmem:[%s4631_s1 + $0x78] sm:$0xff]   ;;  %v3546_v46 = vld [vmem:[%s4631_s1 + $0x140] sm:$0xff]  }
   0xa   :  { %3192 = vmatprep.subr.bf16.mxu1 %v3511_v9  ;;  %v3527_v25 = vld [vmem:[%s4631_s1 + $0xf0] sm:$0xff]   ;;  %v3531_v29 = vld [vmem:[%s4631_s1 + $0xf8] sm:$0xff]   ;;  %v3547_v51 = vld [vmem:[%s4631_s1 + $0x1c0] sm:$0xff]  }
   0xb   :  { %v3528_v26 = vld [vmem:[%s4631_s1 + $0x30] sm:$0xff]   ;;  %v3532_v31 = vld [vmem:[%s4631_s1 + $0x38] sm:$0xff]   ;;  %v3548_v60 = vld [vmem:[%s4631_s1 + $0x100] sm:$0xff]  }
   0xc   :  { %3171 = vmatpush3.bf16.msra.mxu0 %v3512_v10  ;;  %v3529_v27 = vld [vmem:[%s4631_s1 + $0xb0] sm:$0xff]   ;;  %v3533_v32 = vld [vmem:[%s4631_s1 + $0xb8] sm:$0xff]   ;;  %v3549_v1 = vld [vmem:[%s4631_s1 + $0x180] sm:$0xff]  }
   0xd   :  { %3193 = vmatpush3.bf16.msra.mxu1 %v3513_v11  ;;  %3172 = vmatprep.subr.bf16.mxu0 %v3514_v12  ;;  %v3534_v36 = vld [vmem:[%s4630_s0] ss:$48 sps:$4 sm:$0xff]   ;;  %v3542_v41 = vld [vmem:[%s4630_s0 + $0x4] ss:$48 sps:$4 sm:$0xff]   ;;  %v3550_v4 = vld [vmem:[%s4631_s1 + $0x148] sm:$0xff]  }
   0xe   :  { %3194 = vmatprep.subr.bf16.mxu1 %v3515_v13  ;;  %v3536_v37 = vld [vmem:[%s4630_s0 + $0x60] ss:$48 sps:$4 sm:$0xff]   ;;  %v3543_v42 = vld [vmem:[%s4630_s0 + $0x64] ss:$48 sps:$4 sm:$0xff]   ;;  %v133_v47 = vrot.slane %v3534_v36, %v3928_v44  ;;  %v140_v52 = vrot.slane %v3542_v41, %v3928_v44  ;;  %v3551_v7 = vld [vmem:[%s4631_s1 + $0x1c8] sm:$0xff]  }
   0xf   :  { %v3538_v39 = vld [vmem:[%s4630_s0 + $0xc0] ss:$48 sps:$4 sm:$0xff]   ;;  %v3544_v43 = vld [vmem:[%s4630_s0 + $0xc4] ss:$48 sps:$4 sm:$0xff]   ;;  %v147_v48 = vrot.slane %v3536_v37, %v3928_v44  ;;  %v154_v53 = vrot.slane %v3543_v42, %v3928_v44  ;;  %v3552_v8 = vld [vmem:[%s4631_s1 + $0x108] sm:$0xff]  }
  0x10   :  { %3173 = vmatpush3.bf16.msra.mxu0 %v3516_v14  ;;  %v3540_v40 = vld [vmem:[%s4630_s0 + $0x120] ss:$48 sps:$4 sm:$0xff]   ;;  %v3545_v45 = vld [vmem:[%s4630_s0 + $0x124] ss:$48 sps:$4 sm:$0xff]   ;;  %v349_v49 = vrot.slane %v3538_v39, %v3928_v44  ;;  %v356_v54 = vrot.slane %v3544_v43, %v3928_v44  ;;  %v3553_v9 = vld [vmem:[%s4631_s1 + $0x188] sm:$0xff]  }
  0x11   :  { %3195 = vmatpush3.bf16.msra.mxu1 %v3517_v15  ;;  %3174 = vmatprep.subr.bf16.mxu0 %v3518_v16  ;;  %v363_v50 = vrot.slane %v3540_v40, %v3928_v44  ;;  %v370_v55 = vrot.slane %v3545_v45, %v3928_v44  ;;  %v156_v56 = vcombine.high %v133_v47, %v147_v48  ;;  %v3554_v10 = vld [vmem:[%s4631_s1 + $0x150] sm:$0xff]   ;;  %v3558_v14 = vld [vmem:[%s4631_s1 + $0x158] sm:$0xff]  }
  0x12   :  { %3196 = vmatprep.subr.bf16.mxu1 %v3519_v17  ;;  %v155_v58 = vcombine.low %v133_v47, %v147_v48  ;;  %v158_v61 = vcombine.high %v140_v52, %v154_v53  ;;  %v157_v63 = vcombine.low %v140_v52, %v154_v53  ;;  %v3555_v11 = vld [vmem:[%s4631_s1 + $0x1d0] sm:$0xff]   ;;  %v3559_v15 = vld [vmem:[%s4631_s1 + $0x1d8] sm:$0xff]  }
  0x13   :  { %v372_v57 = vcombine.high %v349_v49, %v363_v50  ;;  %v371_v59 = vcombine.low %v349_v49, %v363_v50  ;;  %v374_v62 = vcombine.high %v356_v54, %v370_v55  ;;  %v373_v0 = vcombine.low %v356_v54, %v370_v55  ;;  %v3556_v12 = vld [vmem:[%s4631_s1 + $0x110] sm:$0xff]   ;;  %v3560_v16 = vld [vmem:[%s4631_s1 + $0x118] sm:$0xff]   ;;  %v3590_v50 = vld [vmem:[%s4631_s1 + $0x240] sm:$0xff]  }
  0x14   :  { %3175 = vmatpush3.bf16.msra.mxu0 %v3520_v18  ;;  %v3557_v13 = vld [vmem:[%s4631_s1 + $0x190] sm:$0xff]   ;;  %v3561_v17 = vld [vmem:[%s4631_s1 + $0x198] sm:$0xff]   ;;  %v3562_v18 = vld [vmem:[%s4631_s1 + $0x160] sm:$0xff]  }
  0x15   :  { %3197 = vmatpush3.bf16.msra.mxu1 %v3521_v19  ;;  %3176 = vmatprep.subr.bf16.mxu0 %v3522_v20  ;;  %v604_v2 = vpack.c.bf16 %v372_v57, %v156_v56  ;;  %v603_v3 = vpack.c.bf16 %v371_v59, %v155_v58  ;;  %v606_v5 = vpack.c.bf16 %v374_v62, %v158_v61  ;;  %v3563_v19 = vld [vmem:[%s4631_s1 + $0x1e0] sm:$0xff]   ;;  %v3574_v30 = vld [vmem:[%s4631_s1 + $0x178] sm:$0xff]  }
  0x16   :  { %3198 = vmatprep.subr.bf16.mxu1 %v3523_v21  ;;  %v605_v6 = vpack.c.bf16 %v373_v0, %v157_v63  ;;  %v3564_v20 = vld [vmem:[%s4631_s1 + $0x120] sm:$0xff]   ;;  %v3577_v33 = vld [vmem:[%s4631_s1 + $0x1b8] sm:$0xff]  }
  0x17   :  { %2202 = vmatprep.mubr.bf16.mxu0 %v604_v2  ;;  %2243 = vmatprep.mubr.bf16.mxu1 %v606_v5  ;;  %v3565_v21 = vld [vmem:[%s4631_s1 + $0x1a0] sm:$0xff]   ;;  %v3578_v34 = vld [vmem:[%s4630_s0 + $0x8] ss:$48 sps:$4 sm:$0xff]   ;;  %v3586_v39 = vld [vmem:[%s4630_s0 + $0xc] ss:$48 sps:$4 sm:$0xff]  }
  0x18   :  { %3177 = vmatpush3.bf16.msra.mxu0 %v3524_v22  ;;  %v3566_v22 = vld [vmem:[%s4631_s1 + $0x168] sm:$0xff]   ;;  %v169_v41 = vrot.slane %v3578_v34, %v3928_v44  ;;  %v176_v48 = vrot.slane %v3586_v39, %v3928_v44  ;;  %v3591_v55 = vld [vmem:[%s4631_s1 + $0x2c0] sm:$0xff]  }
  0x19   :  { %3199 = vmatpush3.bf16.msra.mxu1 %v3525_v23  ;;  %3178 = vmatprep.subr.bf16.mxu0 %v3526_v24  ;;  %v3567_v23 = vld [vmem:[%s4631_s1 + $0x1e8] sm:$0xff]   ;;  %v3593_v63 = vld [vmem:[%s4631_s1 + $0x280] sm:$0xff]  }
  0x1a   :  { %3200 = vmatprep.subr.bf16.mxu1 %v3527_v25  ;;  %v3568_v24 = vld [vmem:[%s4631_s1 + $0x128] sm:$0xff]   ;;  %v3626_v34 = vld [vmem:[%s4630_s0 + $0xd0] ss:$48 sps:$4 sm:$0xff]  }
  0x1b   :  { %v3569_v25 = vld [vmem:[%s4631_s1 + $0x1a8] sm:$0xff]  }
  0x1c   :  { %3179 = vmatpush3.bf16.msra.mxu0 %v3528_v26  ;;  %v3570_v26 = vld [vmem:[%s4631_s1 + $0x170] sm:$0xff]   ;;  %v3580_v36 = vld [vmem:[%s4630_s0 + $0x68] ss:$48 sps:$4 sm:$0xff]   ;;  %v3587_v40 = vld [vmem:[%s4630_s0 + $0x6c] ss:$48 sps:$4 sm:$0xff]  }
  0x1d   :  { %3201 = vmatpush3.bf16.msra.mxu1 %v3529_v27  ;;  %3180 = vmatprep.subr.bf16.mxu0 %v3530_v28  ;;  %v3571_v27 = vld [vmem:[%s4631_s1 + $0x1f0] sm:$0xff]   ;;  %v3582_v37 = vld [vmem:[%s4630_s0 + $0xc8] ss:$48 sps:$4 sm:$0xff]   ;;  %v183_v42 = vrot.slane %v3580_v36, %v3928_v44  ;;  %v3588_v45 = vld [vmem:[%s4630_s0 + $0xcc] ss:$48 sps:$4 sm:$0xff]   ;;  %v190_v49 = vrot.slane %v3587_v40, %v3928_v44 }
  0x1e   :  { %3202 = vmatprep.subr.bf16.mxu1 %v3531_v29  ;;  %v3572_v28 = vld [vmem:[%s4631_s1 + $0x130] sm:$0xff]   ;;  %v3584_v38 = vld [vmem:[%s4630_s0 + $0x128] ss:$48 sps:$4 sm:$0xff]   ;;  %v385_v43 = vrot.slane %v3582_v37, %v3928_v44  ;;  %v392_v52 = vrot.slane %v3588_v45, %v3928_v44 }
  0x1f   :  { %v3573_v29 = vld [vmem:[%s4631_s1 + $0x1b0] sm:$0xff]   ;;  %v399_v47 = vrot.slane %v3584_v38, %v3928_v44  ;;  %v191_v54 = vcombine.low %v169_v41, %v183_v42  ;;  %v194_v57 = vcombine.high %v176_v48, %v190_v49  ;;  %v193_v59 = vcombine.low %v176_v48, %v190_v49  ;;  %v3594_v2 = vld [vmem:[%s4631_s1 + $0x248] sm:$0xff]  }
  0x20   :  { %3181 = vmatpush3.bf16.msra.mxu0 %v3532_v31  ;;  %v3575_v31 = vld [vmem:[%s4631_s1 + $0x1f8] sm:$0xff]   ;;  %v3595_v5 = vld [vmem:[%s4631_s1 + $0x2c8] sm:$0xff]   ;;  %v3628_v36 = vld [vmem:[%s4630_s0 + $0x130] ss:$48 sps:$4 sm:$0xff]  }
  0x21   :  { %3203 = vmatpush3.bf16.msra.mxu1 %v3533_v32  ;;  %3210 = vmatprep.subr.bf16.mxu0 %v3546_v46  ;;  %v3576_v32 = vld [vmem:[%s4631_s1 + $0x138] sm:$0xff]   ;;  %v408_v56 = vcombine.high %v385_v43, %v399_v47  ;;  %v407_v58 = vcombine.low %v385_v43, %v399_v47  ;;  %v3630_v37 = vld [vmem:[%s4630_s0 + $0x14] ss:$48 sps:$4 sm:$0xff]   ;;  %v421_v43 = vrot.slane %v3626_v34, %v3928_v44 }
  0x22   :  { %3232 = vmatprep.subr.bf16.mxu1 %v3547_v51  ;;  %v3589_v46 = vld [vmem:[%s4630_s0 + $0x12c] ss:$48 sps:$4 sm:$0xff]   ;;  %v192_v51 = vcombine.high %v169_v41, %v183_v42  ;;  %v3631_v40 = vld [vmem:[%s4630_s0 + $0x74] ss:$48 sps:$4 sm:$0xff]   ;;  %v435_v45 = vrot.slane %v3628_v36, %v3928_v44 }
  0x23   :  { %2203 = vmatmul.mubr.bf16.vlgmr.msra.gmra.mrb[0].mxu0 %v603_v3  ;;  %v406_v53 = vrot.slane %v3589_v46, %v3928_v44  ;;  %v3632_v41 = vld [vmem:[%s4630_s0 + $0xd4] ss:$48 sps:$4 sm:$0xff]   ;;  %v212_v46 = vrot.slane %v3630_v37, %v3928_v44  ;;  %v226_v49 = vrot.slane %v3631_v40, %v3928_v44  ;;  %v3674_v36 = vld [vmem:[%s4630_s0 + $0x1c] ss:$48 sps:$4 sm:$0xff]  }
  0x24   :  { %2244 = vmatmul.mubr.bf16.vlgmr.msra.gmra.mrb[0].mxu1 %v605_v6  ;;  %3211 = vmatpush3.bf16.msra.mxu0 %v3548_v60  ;;  %v3592_v60 = vld [vmem:[%s4631_s1 + $0x200] sm:$0xff]   ;;  %v608_v0 = vpack.c.bf16 %v408_v56, %v192_v51  ;;  %v3596_v6 = vld [vmem:[%s4631_s1 + $0x208] sm:$0xff]  }
  0x25   :  { %3233 = vmatpush3.bf16.msra.mxu1 %v3549_v1  ;;  %3212 = vmatprep.subr.bf16.mxu0 %v3550_v4  ;;  %v410_v61 = vcombine.high %v392_v52, %v406_v53  ;;  %v409_v62 = vcombine.low %v392_v52, %v406_v53  ;;  %v607_v1 = vpack.c.bf16 %v407_v58, %v191_v54  ;;  %v3633_v42 = vld [vmem:[%s4630_s0 + $0x134] ss:$48 sps:$4 sm:$0xff]   ;;  %v3675_v37 = vld [vmem:[%s4630_s0 + $0x7c] ss:$48 sps:$4 sm:$0xff]  }
  0x26   :  { %3234 = vmatprep.subr.bf16.mxu1 %v3551_v7  ;;  %2284 = vmatprep.mubr.bf16.mxu0 %v608_v0  ;;  %v3597_v7 = vld [vmem:[%s4631_s1 + $0x288] sm:$0xff]   ;;  %v3634_v47 = vld [vmem:[%s4631_s1 + $0x340] sm:$0xff]   ;;  %v442_v51 = vrot.slane %v3633_v42, %v3928_v44  ;;  %v444_v53 = vcombine.high %v421_v43, %v435_v45 }
  0x27   :  { %v610_v3 = vpack.c.bf16 %v410_v61, %v194_v57  ;;  %v609_v4 = vpack.c.bf16 %v409_v62, %v193_v59  ;;  %v3635_v52 = vld [vmem:[%s4631_s1 + $0x3c0] sm:$0xff]   ;;  %v230_v57 = vcombine.high %v212_v46, %v226_v49  ;;  %v229_v59 = vcombine.low %v212_v46, %v226_v49  ;;  %v3638_v0 = vld [vmem:[%s4631_s1 + $0x348] sm:$0xff]  }
  0x28   :  { %3213 = vmatpush3.bf16.msra.mxu0 %v3552_v8  ;;  %v3598_v8 = vld [vmem:[%s4631_s1 + $0x250] sm:$0xff]   ;;  %v3636_v56 = vld [vmem:[%s4631_s1 + $0x300] sm:$0xff]   ;;  %v3677_v42 = vld [vmem:[%s4630_s0 + $0x13c] ss:$48 sps:$4 sm:$0xff]  }
  0x29   :  { %3235 = vmatpush3.bf16.msra.mxu1 %v3553_v9  ;;  %3214 = vmatprep.subr.bf16.mxu0 %v3554_v10  ;;  %v3599_v9 = vld [vmem:[%s4631_s1 + $0x2d0] sm:$0xff]   ;;  %v3637_v61 = vld [vmem:[%s4631_s1 + $0x380] sm:$0xff]  }
  0x2a   :  { %3236 = vmatprep.subr.bf16.mxu1 %v3555_v11  ;;  %2325 = vmatprep.mubr.bf16.mxu1 %v610_v3  ;;  %v3600_v10 = vld [vmem:[%s4631_s1 + $0x210] sm:$0xff]   ;;  %v3639_v3 = vld [vmem:[%s4631_s1 + $0x3c8] sm:$0xff]  }
  0x2b   :  { %v3601_v11 = vld [vmem:[%s4631_s1 + $0x290] sm:$0xff]  }
  0x2c   :  { %3215 = vmatpush3.bf16.msra.mxu0 %v3556_v12  ;;  %v3602_v12 = vld [vmem:[%s4631_s1 + $0x258] sm:$0xff]  }
  0x2d   :  { %3237 = vmatpush3.bf16.msra.mxu1 %v3557_v13  ;;  %3216 = vmatprep.subr.bf16.mxu0 %v3558_v14  ;;  %v3603_v13 = vld [vmem:[%s4631_s1 + $0x2d8] sm:$0xff]  }
  0x2e   :  { %3238 = vmatprep.subr.bf16.mxu1 %v3559_v15  ;;  %v3604_v14 = vld [vmem:[%s4631_s1 + $0x218] sm:$0xff]  }
  0x2f   :  { %v3605_v15 = vld [vmem:[%s4631_s1 + $0x298] sm:$0xff]  }
  0x30   :  { %3217 = vmatpush3.bf16.msra.mxu0 %v3560_v16  ;;  %v3606_v16 = vld [vmem:[%s4631_s1 + $0x260] sm:$0xff]  }
  0x31   :  { %3239 = vmatpush3.bf16.msra.mxu1 %v3561_v17  ;;  %3218 = vmatprep.subr.bf16.mxu0 %v3562_v18  ;;  %v3607_v17 = vld [vmem:[%s4631_s1 + $0x2e0] sm:$0xff]  }
  0x32   :  { %3240 = vmatprep.subr.bf16.mxu1 %v3563_v19  ;;  %v3608_v18 = vld [vmem:[%s4631_s1 + $0x220] sm:$0xff]  }
  0x33   :  { %v3609_v19 = vld [vmem:[%s4631_s1 + $0x2a0] sm:$0xff]  }
  0x34   :  { %3219 = vmatpush3.bf16.msra.mxu0 %v3564_v20  ;;  %v3610_v20 = vld [vmem:[%s4631_s1 + $0x268] sm:$0xff]  }
  0x35   :  { %3241 = vmatpush3.bf16.msra.mxu1 %v3565_v21  ;;  %3220 = vmatprep.subr.bf16.mxu0 %v3566_v22  ;;  %v3611_v21 = vld [vmem:[%s4631_s1 + $0x2e8] sm:$0xff]  }
  0x36   :  { %3242 = vmatprep.subr.bf16.mxu1 %v3567_v23  ;;  %v3612_v22 = vld [vmem:[%s4631_s1 + $0x228] sm:$0xff]  }
  0x37   :  { %v3613_v23 = vld [vmem:[%s4631_s1 + $0x2a8] sm:$0xff]  }
  0x38   :  { %3221 = vmatpush3.bf16.msra.mxu0 %v3568_v24  ;;  %v3614_v24 = vld [vmem:[%s4631_s1 + $0x270] sm:$0xff]  }
  0x39   :  { %3243 = vmatpush3.bf16.msra.mxu1 %v3569_v25  ;;  %3222 = vmatprep.subr.bf16.mxu0 %v3570_v26  ;;  %v3615_v25 = vld [vmem:[%s4631_s1 + $0x2f0] sm:$0xff]  }
  0x3a   :  { %3244 = vmatprep.subr.bf16.mxu1 %v3571_v27  ;;  %v3616_v26 = vld [vmem:[%s4631_s1 + $0x230] sm:$0xff]  }
  0x3b   :  { %v3617_v27 = vld [vmem:[%s4631_s1 + $0x2b0] sm:$0xff]  }
  0x3c   :  { %3223 = vmatpush3.bf16.msra.mxu0 %v3572_v28  ;;  %v3618_v28 = vld [vmem:[%s4631_s1 + $0x278] sm:$0xff]  }
  0x3d   :  { %3245 = vmatpush3.bf16.msra.mxu1 %v3573_v29  ;;  %3224 = vmatprep.subr.bf16.mxu0 %v3574_v30  ;;  %v3619_v29 = vld [vmem:[%s4631_s1 + $0x2f8] sm:$0xff]  }
  0x3e   :  { %3246 = vmatprep.subr.bf16.mxu1 %v3575_v31  ;;  %v3620_v30 = vld [vmem:[%s4631_s1 + $0x238] sm:$0xff]  }
  0x3f   :  { %v3621_v31 = vld [vmem:[%s4631_s1 + $0x2b8] sm:$0xff]  }
  0x40   :  { %3225 = vmatpush3.bf16.msra.mxu0 %v3576_v32  ;;  %v3622_v32 = vld [vmem:[%s4630_s0 + $0x10] ss:$48 sps:$4 sm:$0xff]  }
  0x41   :  { %3247 = vmatpush3.bf16.msra.mxu1 %v3577_v33  ;;  %3254 = vmatprep.subr.bf16.mxu0 %v3590_v50  ;;  %v3624_v33 = vld [vmem:[%s4630_s0 + $0x70] ss:$48 sps:$4 sm:$0xff]   ;;  %v205_v38 = vrot.slane %v3622_v32, %v3928_v44  ;;  %v428_v50 = vrot.slane %v3632_v41, %v3928_v44  ;;  %v3670_v32 = vld [vmem:[%s4630_s0 + $0xd8] ss:$48 sps:$4 sm:$0xff]  }
  0x42   :  { %3276 = vmatprep.subr.bf16.mxu1 %v3591_v55  ;;  %v219_v39 = vrot.slane %v3624_v33, %v3928_v44  ;;  %v443_v55 = vcombine.low %v421_v43, %v435_v45  ;;  %v3672_v33 = vld [vmem:[%s4630_s0 + $0x138] ss:$48 sps:$4 sm:$0xff]   ;;  %v457_v40 = vrot.slane %v3670_v32, %v3928_v44  ;;  %v248_v43 = vrot.slane %v3674_v36, %v3928_v44  ;;  %v3718_v32 = vld [vmem:[%s4630_s0 + $0x24] ss:$48 sps:$4 sm:$0xff]  }
  0x43   :  { %2285 = vmatmul.mubr.bf16.vlgmr.msra.gmra.mrb[4].mxu0 %v607_v1  ;;  %v446_v58 = vcombine.high %v428_v50, %v442_v51  ;;  %v471_v41 = vrot.slane %v3672_v33, %v3928_v44  ;;  %v262_v45 = vrot.slane %v3675_v37, %v3928_v44  ;;  %v3719_v33 = vld [vmem:[%s4630_s0 + $0x84] ss:$48 sps:$4 sm:$0xff]  }
  0x44   :  { %2326 = vmatmul.mubr.bf16.vlgmr.msra.gmra.mrb[4].mxu1 %v609_v4  ;;  %3255 = vmatpush3.bf16.msra.mxu0 %v3592_v60  ;;  %v228_v48 = vcombine.high %v205_v38, %v219_v39  ;;  %v227_v54 = vcombine.low %v205_v38, %v219_v39  ;;  %v445_v60 = vcombine.low %v428_v50, %v442_v51  ;;  %v3640_v4 = vld [vmem:[%s4631_s1 + $0x308] sm:$0xff]  }
  0x45   :  { %3277 = vmatpush3.bf16.msra.mxu1 %v3593_v63  ;;  %3256 = vmatprep.subr.bf16.mxu0 %v3594_v2  ;;  %v614_v1 = vpack.c.bf16 %v446_v58, %v230_v57  ;;  %v3676_v38 = vld [vmem:[%s4630_s0 + $0xdc] ss:$48 sps:$4 sm:$0xff]   ;;  %v480_v49 = vcombine.high %v457_v40, %v471_v41  ;;  %v478_v50 = vrot.slane %v3677_v42, %v3928_v44 }
  0x46   :  { %3278 = vmatprep.subr.bf16.mxu1 %v3595_v5  ;;  %v612_v62 = vpack.c.bf16 %v444_v53, %v228_v48  ;;  %v611_v63 = vpack.c.bf16 %v443_v55, %v227_v54  ;;  %v613_v2 = vpack.c.bf16 %v445_v60, %v229_v59  ;;  %v3641_v5 = vld [vmem:[%s4631_s1 + $0x388] sm:$0xff]   ;;  %v464_v46 = vrot.slane %v3676_v38, %v3928_v44  ;;  %v3681_v60 = vld [vmem:[%s4631_s1 + $0x480] sm:$0xff]  }
  0x47   :  { %2407 = vmatprep.mubr.bf16.mxu1 %v614_v1  ;;  %v266_v53 = vcombine.high %v248_v43, %v262_v45  ;;  %v479_v54 = vcombine.low %v457_v40, %v471_v41  ;;  %v265_v55 = vcombine.low %v248_v43, %v262_v45  ;;  %v3683_v1 = vld [vmem:[%s4631_s1 + $0x4c8] sm:$0xff]   ;;  %v3720_v38 = vld [vmem:[%s4630_s0 + $0xe4] ss:$48 sps:$4 sm:$0xff]   ;;  %v284_v41 = vrot.slane %v3718_v32, %v3928_v44 }
  0x48   :  { %3257 = vmatpush3.bf16.msra.mxu0 %v3596_v6  ;;  %2366 = vmatprep.mubr.bf16.mxu0 %v612_v62  ;;  %v3642_v6 = vld [vmem:[%s4631_s1 + $0x350] sm:$0xff]   ;;  %v482_v58 = vcombine.high %v464_v46, %v478_v50  ;;  %v481_v59 = vcombine.low %v464_v46, %v478_v50  ;;  %v3682_v62 = vld [vmem:[%s4631_s1 + $0x448] sm:$0xff]   ;;  %v298_v42 = vrot.slane %v3719_v33, %v3928_v44  ;;  %v3722_v43 = vld [vmem:[%s4631_s1 + $0x540] sm:$0xff]  }
  0x49   :  { %3279 = vmatpush3.bf16.msra.mxu1 %v3597_v7  ;;  %3258 = vmatprep.subr.bf16.mxu0 %v3598_v8  ;;  %v3643_v7 = vld [vmem:[%s4631_s1 + $0x3d0] sm:$0xff]   ;;  %v500_v46 = vrot.slane %v3720_v38, %v3928_v44  ;;  %v3763_v33 = vld [vmem:[%s4630_s0 + $0x8c] ss:$48 sps:$4 sm:$0xff]  }
  0x4a   :  { %3280 = vmatprep.subr.bf16.mxu1 %v3599_v9  ;;  %v3644_v8 = vld [vmem:[%s4631_s1 + $0x310] sm:$0xff]  }
  0x4b   :  { %v3645_v9 = vld [vmem:[%s4631_s1 + $0x390] sm:$0xff]  }
  0x4c   :  { %3259 = vmatpush3.bf16.msra.mxu0 %v3600_v10  ;;  %v3646_v10 = vld [vmem:[%s4631_s1 + $0x358] sm:$0xff]  }
  0x4d   :  { %3281 = vmatpush3.bf16.msra.mxu1 %v3601_v11  ;;  %3260 = vmatprep.subr.bf16.mxu0 %v3602_v12  ;;  %v3647_v11 = vld [vmem:[%s4631_s1 + $0x3d8] sm:$0xff]  }
  0x4e   :  { %3282 = vmatprep.subr.bf16.mxu1 %v3603_v13  ;;  %v3648_v12 = vld [vmem:[%s4631_s1 + $0x318] sm:$0xff]  }
  0x4f   :  { %v3649_v13 = vld [vmem:[%s4631_s1 + $0x398] sm:$0xff]  }
  0x50   :  { %3261 = vmatpush3.bf16.msra.mxu0 %v3604_v14  ;;  %v3650_v14 = vld [vmem:[%s4631_s1 + $0x360] sm:$0xff]  }
  0x51   :  { %3283 = vmatpush3.bf16.msra.mxu1 %v3605_v15  ;;  %3262 = vmatprep.subr.bf16.mxu0 %v3606_v16  ;;  %v3651_v15 = vld [vmem:[%s4631_s1 + $0x3e0] sm:$0xff]  }
  0x52   :  { %3284 = vmatprep.subr.bf16.mxu1 %v3607_v17  ;;  %v3652_v16 = vld [vmem:[%s4631_s1 + $0x320] sm:$0xff]  }
  0x53   :  { %v3653_v17 = vld [vmem:[%s4631_s1 + $0x3a0] sm:$0xff]  }
  0x54   :  { %3263 = vmatpush3.bf16.msra.mxu0 %v3608_v18  ;;  %v3654_v18 = vld [vmem:[%s4631_s1 + $0x368] sm:$0xff]  }
  0x55   :  { %3285 = vmatpush3.bf16.msra.mxu1 %v3609_v19  ;;  %3264 = vmatprep.subr.bf16.mxu0 %v3610_v20  ;;  %v3655_v19 = vld [vmem:[%s4631_s1 + $0x3e8] sm:$0xff]  }
  0x56   :  { %3286 = vmatprep.subr.bf16.mxu1 %v3611_v21  ;;  %v3656_v20 = vld [vmem:[%s4631_s1 + $0x328] sm:$0xff]  }
  0x57   :  { %v3657_v21 = vld [vmem:[%s4631_s1 + $0x3a8] sm:$0xff]  }
  0x58   :  { %3265 = vmatpush3.bf16.msra.mxu0 %v3612_v22  ;;  %v3658_v22 = vld [vmem:[%s4631_s1 + $0x370] sm:$0xff]  }
  0x59   :  { %3287 = vmatpush3.bf16.msra.mxu1 %v3613_v23  ;;  %3266 = vmatprep.subr.bf16.mxu0 %v3614_v24  ;;  %v3659_v23 = vld [vmem:[%s4631_s1 + $0x3f0] sm:$0xff]  }
  0x5a   :  { %3288 = vmatprep.subr.bf16.mxu1 %v3615_v25  ;;  %v3660_v24 = vld [vmem:[%s4631_s1 + $0x330] sm:$0xff]  }
  0x5b   :  { %v3661_v25 = vld [vmem:[%s4631_s1 + $0x3b0] sm:$0xff]  }
  0x5c   :  { %3267 = vmatpush3.bf16.msra.mxu0 %v3616_v26  ;;  %v3662_v26 = vld [vmem:[%s4631_s1 + $0x378] sm:$0xff]  }
  0x5d   :  { %3289 = vmatpush3.bf16.msra.mxu1 %v3617_v27  ;;  %3268 = vmatprep.subr.bf16.mxu0 %v3618_v28  ;;  %v3663_v27 = vld [vmem:[%s4631_s1 + $0x3f8] sm:$0xff]  }
  0x5e   :  { %3290 = vmatprep.subr.bf16.mxu1 %v3619_v29  ;;  %v3664_v28 = vld [vmem:[%s4631_s1 + $0x338] sm:$0xff]  }
  0x5f   :  { %v3665_v29 = vld [vmem:[%s4631_s1 + $0x3b8] sm:$0xff]  }
  0x60   :  { %3269 = vmatpush3.bf16.msra.mxu0 %v3620_v30  ;;  %v3666_v30 = vld [vmem:[%s4630_s0 + $0x18] ss:$48 sps:$4 sm:$0xff]  }
  0x61   :  { %3291 = vmatpush3.bf16.msra.mxu1 %v3621_v31  ;;  %3298 = vmatprep.subr.bf16.mxu0 %v3634_v47  ;;  %v3668_v31 = vld [vmem:[%s4630_s0 + $0x78] ss:$48 sps:$4 sm:$0xff]   ;;  %v241_v34 = vrot.slane %v3666_v30, %v3928_v44  ;;  %v3678_v47 = vld [vmem:[%s4631_s1 + $0x440] sm:$0xff]  }
  0x62   :  { %3320 = vmatprep.subr.bf16.mxu1 %v3635_v52  ;;  %v255_v39 = vrot.slane %v3668_v31, %v3928_v44  ;;  %v3679_v52 = vld [vmem:[%s4631_s1 + $0x4c0] sm:$0xff]  }
  0x63   :  { %2367 = vmatmul.mubr.bf16.vlgmr.msra.gmra.mrb[8].mxu0 %v611_v63  ;;  %v618_v63 = vpack.c.bf16 %v482_v58, %v266_v53  ;;  %v3714_v30 = vld [vmem:[%s4630_s0 + $0xe0] ss:$48 sps:$4 sm:$0xff]   ;;  %v301_v53 = vcombine.low %v284_v41, %v298_v42 }
  0x64   :  { %2408 = vmatmul.mubr.bf16.vlgmr.msra.gmra.mrb[8].mxu1 %v613_v2  ;;  %3299 = vmatpush3.bf16.msra.mxu0 %v3636_v56  ;;  %v264_v48 = vcombine.high %v241_v34, %v255_v39  ;;  %v263_v51 = vcombine.low %v241_v34, %v255_v39  ;;  %v3680_v56 = vld [vmem:[%s4631_s1 + $0x400] sm:$0xff]   ;;  %v3684_v2 = vld [vmem:[%s4631_s1 + $0x408] sm:$0xff]   ;;  %v493_v37 = vrot.slane %v3714_v30, %v3928_v44 }
  0x65   :  { %3321 = vmatpush3.bf16.msra.mxu1 %v3637_v61  ;;  %3300 = vmatprep.subr.bf16.mxu0 %v3638_v0  ;;  %v617_v0 = vpack.c.bf16 %v481_v59, %v265_v55  ;;  %v3716_v31 = vld [vmem:[%s4630_s0 + $0x140] ss:$48 sps:$4 sm:$0xff]   ;;  %v3721_v39 = vld [vmem:[%s4630_s0 + $0x144] ss:$48 sps:$4 sm:$0xff]   ;;  %v3762_v30 = vld [vmem:[%s4630_s0 + $0x2c] ss:$48 sps:$4 sm:$0xff]  }
  0x66   :  { %3322 = vmatprep.subr.bf16.mxu1 %v3639_v3  ;;  %v616_v57 = vpack.c.bf16 %v480_v49, %v264_v48  ;;  %v615_v61 = vpack.c.bf16 %v479_v54, %v263_v51  ;;  %2489 = vmatprep.mubr.bf16.mxu1 %v618_v63  ;;  %v3685_v3 = vld [vmem:[%s4631_s1 + $0x488] sm:$0xff]   ;;  %v507_v40 = vrot.slane %v3716_v31, %v3928_v44  ;;  %v3723_v49 = vld [vmem:[%s4631_s1 + $0x5c0] sm:$0xff]  }
  0x67   :  { %v302_v51 = vcombine.high %v284_v41, %v298_v42  ;;  %v3724_v54 = vld [vmem:[%s4631_s1 + $0x500] sm:$0xff]   ;;  %v3727_v63 = vld [vmem:[%s4631_s1 + $0x5c8] sm:$0xff]   ;;  %v334_v41 = vrot.slane %v3763_v33, %v3928_v44  ;;  %v2670_v33 = vld [vmem:[%s4633_s3 + $0x30] sm:$0xff] }
  0x68   :  { %3301 = vmatpush3.bf16.msra.mxu0 %v3640_v4  ;;  %2448 = vmatprep.mubr.bf16.mxu0 %v616_v57  ;;  %v3686_v4 = vld [vmem:[%s4631_s1 + $0x450] sm:$0xff]   ;;  %v516_v50 = vcombine.high %v493_v37, %v507_v40  ;;  %v3725_v57 = vld [vmem:[%s4631_s1 + $0x580] sm:$0xff]  }
  0x69   :  { %3323 = vmatpush3.bf16.msra.mxu1 %v3641_v5  ;;  %3302 = vmatprep.subr.bf16.mxu0 %v3642_v6  ;;  %v3687_v5 = vld [vmem:[%s4631_s1 + $0x4d0] sm:$0xff]  }
  0x6a   :  { %3324 = vmatprep.subr.bf16.mxu1 %v3643_v7  ;;  %v3688_v6 = vld [vmem:[%s4631_s1 + $0x410] sm:$0xff]  }
  0x6b   :  { %v3689_v7 = vld [vmem:[%s4631_s1 + $0x490] sm:$0xff]  }
  0x6c   :  { %3303 = vmatpush3.bf16.msra.mxu0 %v3644_v8  ;;  %v3690_v8 = vld [vmem:[%s4631_s1 + $0x458] sm:$0xff]  }
  0x6d   :  { %3325 = vmatpush3.bf16.msra.mxu1 %v3645_v9  ;;  %3304 = vmatprep.subr.bf16.mxu0 %v3646_v10  ;;  %v3691_v9 = vld [vmem:[%s4631_s1 + $0x4d8] sm:$0xff]  }
  0x6e   :  { %3326 = vmatprep.subr.bf16.mxu1 %v3647_v11  ;;  %v3692_v10 = vld [vmem:[%s4631_s1 + $0x418] sm:$0xff]  }
  0x6f   :  { %v3693_v11 = vld [vmem:[%s4631_s1 + $0x498] sm:$0xff]  }
  0x70   :  { %3305 = vmatpush3.bf16.msra.mxu0 %v3648_v12  ;;  %v3694_v12 = vld [vmem:[%s4631_s1 + $0x460] sm:$0xff]  }
  0x71   :  { %3327 = vmatpush3.bf16.msra.mxu1 %v3649_v13  ;;  %3306 = vmatprep.subr.bf16.mxu0 %v3650_v14  ;;  %v3695_v13 = vld [vmem:[%s4631_s1 + $0x4e0] sm:$0xff]  }
  0x72   :  { %3328 = vmatprep.subr.bf16.mxu1 %v3651_v15  ;;  %v3696_v14 = vld [vmem:[%s4631_s1 + $0x420] sm:$0xff]  }
  0x73   :  { %v3697_v15 = vld [vmem:[%s4631_s1 + $0x4a0] sm:$0xff]  }
  0x74   :  { %3307 = vmatpush3.bf16.msra.mxu0 %v3652_v16  ;;  %v3698_v16 = vld [vmem:[%s4631_s1 + $0x468] sm:$0xff]  }
  0x75   :  { %3329 = vmatpush3.bf16.msra.mxu1 %v3653_v17  ;;  %3308 = vmatprep.subr.bf16.mxu0 %v3654_v18  ;;  %v3699_v17 = vld [vmem:[%s4631_s1 + $0x4e8] sm:$0xff]  }
  0x76   :  { %3330 = vmatprep.subr.bf16.mxu1 %v3655_v19  ;;  %v3700_v18 = vld [vmem:[%s4631_s1 + $0x428] sm:$0xff]  }
  0x77   :  { %v3701_v19 = vld [vmem:[%s4631_s1 + $0x4a8] sm:$0xff]  }
  0x78   :  { %3309 = vmatpush3.bf16.msra.mxu0 %v3656_v20  ;;  %v3702_v20 = vld [vmem:[%s4631_s1 + $0x470] sm:$0xff]  }
  0x79   :  { %3331 = vmatpush3.bf16.msra.mxu1 %v3657_v21  ;;  %3310 = vmatprep.subr.bf16.mxu0 %v3658_v22  ;;  %v3703_v21 = vld [vmem:[%s4631_s1 + $0x4f0] sm:$0xff]  }
  0x7a   :  { %3332 = vmatprep.subr.bf16.mxu1 %v3659_v23  ;;  %v3704_v22 = vld [vmem:[%s4631_s1 + $0x430] sm:$0xff]  }
  0x7b   :  { %v3705_v23 = vld [vmem:[%s4631_s1 + $0x4b0] sm:$0xff]  }
  0x7c   :  { %3311 = vmatpush3.bf16.msra.mxu0 %v3660_v24  ;;  %v3706_v24 = vld [vmem:[%s4631_s1 + $0x478] sm:$0xff]  }
  0x7d   :  { %3333 = vmatpush3.bf16.msra.mxu1 %v3661_v25  ;;  %3312 = vmatprep.subr.bf16.mxu0 %v3662_v26  ;;  %v3707_v25 = vld [vmem:[%s4631_s1 + $0x4f8] sm:$0xff]  }
  0x7e   :  { %3334 = vmatprep.subr.bf16.mxu1 %v3663_v27  ;;  %v3708_v26 = vld [vmem:[%s4631_s1 + $0x438] sm:$0xff]  }
  0x7f   :  { %v3709_v27 = vld [vmem:[%s4631_s1 + $0x4b8] sm:$0xff]  }
  0x80   :  { %3313 = vmatpush3.bf16.msra.mxu0 %v3664_v28  ;;  %v3710_v28 = vld [vmem:[%s4630_s0 + $0x20] ss:$48 sps:$4 sm:$0xff]  }
  0x81   :  { %3335 = vmatpush3.bf16.msra.mxu1 %v3665_v29  ;;  %3342 = vmatprep.subr.bf16.mxu0 %v3678_v47  ;;  %v3712_v29 = vld [vmem:[%s4630_s0 + $0x80] ss:$48 sps:$4 sm:$0xff]   ;;  %v277_v34 = vrot.slane %v3710_v28, %v3928_v44  ;;  %v514_v47 = vrot.slane %v3721_v39, %v3928_v44  ;;  %v3758_v28 = vld [vmem:[%s4630_s0 + $0xe8] ss:$48 sps:$4 sm:$0xff]   ;;  %v320_v39 = vrot.slane %v3762_v30, %v3928_v44 }
  0x82   :  { %3364 = vmatprep.subr.bf16.mxu1 %v3679_v52  ;;  %v291_v36 = vrot.slane %v3712_v29, %v3928_v44  ;;  %v515_v52 = vcombine.low %v493_v37, %v507_v40  ;;  %v3760_v29 = vld [vmem:[%s4630_s0 + $0x148] ss:$48 sps:$4 sm:$0xff]   ;;  %v529_v37 = vrot.slane %v3758_v28, %v3928_v44  ;;  %v2668_v30 = vld [vmem:[%s4633_s3 + $0x20] sm:$0xff] }
  0x83   :  { %2449 = vmatmul.mubr.bf16.vlgmr.msra.gmra.mrb[12].mxu0 %v615_v61  ;;  %v518_v55 = vcombine.high %v500_v46, %v514_v47  ;;  %v543_v38 = vrot.slane %v3760_v29, %v3928_v44  ;;  %v2667_v28 = vld [vmem:[%s4633_s3 + $0x18] sm:$0xff] }
  0x84   :  { %3343 = vmatpush3.bf16.msra.mxu0 %v3680_v56  ;;  %2490 = vmatmul.mubr.bf16.vlgmr.msra.gmra.mrb[12].mxu1 %v617_v0  ;;  %v300_v45 = vcombine.high %v277_v34, %v291_v36  ;;  %v299_v48 = vcombine.low %v277_v34, %v291_v36  ;;  %v517_v56 = vcombine.low %v500_v46, %v514_v47  ;;  %v3728_v0 = vld [vmem:[%s4631_s1 + $0x508] sm:$0xff]  }
  0x85   :  { %3344 = vmatprep.subr.bf16.mxu0 %v3682_v62  ;;  %3365 = vmatpush3.bf16.msra.mxu1 %v3681_v60  ;;  %v3726_v60 = vld [vmem:[%s4631_s1 + $0x548] sm:$0xff]   ;;  %v622_v61 = vpack.c.bf16 %v518_v55, %v302_v51  ;;  %v551_v47 = vcombine.low %v529_v37, %v543_v38 }
  0x86   :  { %3366 = vmatprep.subr.bf16.mxu1 %v3683_v1  ;;  %v620_v58 = vpack.c.bf16 %v516_v50, %v300_v45  ;;  %v619_v59 = vpack.c.bf16 %v515_v52, %v299_v48  ;;  %v621_v62 = vpack.c.bf16 %v517_v56, %v301_v53  ;;  %v3729_v1 = vld [vmem:[%s4631_s1 + $0x588] sm:$0xff]   ;;  %v552_v45 = vcombine.high %v529_v37, %v543_v38  ;;  %v2763_v37 = vld [vmem:[%s4635_s5] sm:$0xff] }
  0x87   :  { %2571 = vmatprep.mubr.bf16.mxu1 %v622_v61  ;;  %v3764_v34 = vld [vmem:[%s4630_s0 + $0xec] ss:$48 sps:$4 sm:$0xff]   ;;  %v338_v48 = vcombine.high %v320_v39, %v334_v41  ;;  %v337_v50 = vcombine.low %v320_v39, %v334_v41 }
  0x88   :  { %3345 = vmatpush3.bf16.msra.mxu0 %v3684_v2  ;;  %2530 = vmatprep.mubr.bf16.mxu0 %v620_v58  ;;  %v3730_v2 = vld [vmem:[%s4631_s1 + $0x550] sm:$0xff]   ;;  %v3765_v36 = vld [vmem:[%s4630_s0 + $0x14c] ss:$48 sps:$4 sm:$0xff]   ;;  %v536_v42 = vrot.slane %v3764_v34, %v3928_v44 }
  0x89   :  { %3346 = vmatprep.subr.bf16.mxu0 %v3686_v4  ;;  %3367 = vmatpush3.bf16.msra.mxu1 %v3685_v3  ;;  %v3731_v3 = vld [vmem:[%s4631_s1 + $0x5d0] sm:$0xff]   ;;  %v2671_v34 = vld [vmem:[%s4633_s3 + $0x38] sm:$0xff]  ;;  %v2764_v38 = vld [vmem:[%s4635_s5 + $0x8] sm:$0xff] }
  0x8a   :  { %3368 = vmatprep.subr.bf16.mxu1 %v3687_v5  ;;  %v3732_v4 = vld [vmem:[%s4631_s1 + $0x510] sm:$0xff]   ;;  %v3492_v39 = vpack.c.bf16 %v2764_v38, %v2763_v37 }
  0x8b   :  { %v3733_v5 = vld [vmem:[%s4631_s1 + $0x590] sm:$0xff]  }
  0x8c   :  { %3347 = vmatpush3.bf16.msra.mxu0 %v3688_v6  ;;  %v3734_v6 = vld [vmem:[%s4631_s1 + $0x558] sm:$0xff]  }
  0x8d   :  { %3348 = vmatprep.subr.bf16.mxu0 %v3690_v8  ;;  %3369 = vmatpush3.bf16.msra.mxu1 %v3689_v7  ;;  %v3735_v7 = vld [vmem:[%s4631_s1 + $0x5d8] sm:$0xff]  }
  0x8e   :  { %3370 = vmatprep.subr.bf16.mxu1 %v3691_v9  ;;  %v3736_v8 = vld [vmem:[%s4631_s1 + $0x518] sm:$0xff]  }
  0x8f   :  { %v3737_v9 = vld [vmem:[%s4631_s1 + $0x598] sm:$0xff]  }
  0x90   :  { %3349 = vmatpush3.bf16.msra.mxu0 %v3692_v10  ;;  %v3738_v10 = vld [vmem:[%s4631_s1 + $0x560] sm:$0xff]  }
  0x91   :  { %3350 = vmatprep.subr.bf16.mxu0 %v3694_v12  ;;  %3371 = vmatpush3.bf16.msra.mxu1 %v3693_v11  ;;  %v3739_v11 = vld [vmem:[%s4631_s1 + $0x5e0] sm:$0xff]  }
  0x92   :  { %3372 = vmatprep.subr.bf16.mxu1 %v3695_v13  ;;  %v3740_v12 = vld [vmem:[%s4631_s1 + $0x520] sm:$0xff]  }
  0x93   :  { %v3741_v13 = vld [vmem:[%s4631_s1 + $0x5a0] sm:$0xff]  }
  0x94   :  { %3351 = vmatpush3.bf16.msra.mxu0 %v3696_v14  ;;  %v3742_v14 = vld [vmem:[%s4631_s1 + $0x568] sm:$0xff]  }
  0x95   :  { %3352 = vmatprep.subr.bf16.mxu0 %v3698_v16  ;;  %3373 = vmatpush3.bf16.msra.mxu1 %v3697_v15  ;;  %v3743_v15 = vld [vmem:[%s4631_s1 + $0x5e8] sm:$0xff]  }
  0x96   :  { %3374 = vmatprep.subr.bf16.mxu1 %v3699_v17  ;;  %v3744_v16 = vld [vmem:[%s4631_s1 + $0x528] sm:$0xff]  }
  0x97   :  { %v3745_v17 = vld [vmem:[%s4631_s1 + $0x5a8] sm:$0xff]  }
  0x98   :  { %3353 = vmatpush3.bf16.msra.mxu0 %v3700_v18  ;;  %v3746_v18 = vld [vmem:[%s4631_s1 + $0x570] sm:$0xff]  }
  0x99   :  { %3354 = vmatprep.subr.bf16.mxu0 %v3702_v20  ;;  %3375 = vmatpush3.bf16.msra.mxu1 %v3701_v19  ;;  %v3747_v19 = vld [vmem:[%s4631_s1 + $0x5f0] sm:$0xff]  }
  0x9a   :  { %3376 = vmatprep.subr.bf16.mxu1 %v3703_v21  ;;  %v3748_v20 = vld [vmem:[%s4631_s1 + $0x530] sm:$0xff]  }
  0x9b   :  { %v3749_v21 = vld [vmem:[%s4631_s1 + $0x5b0] sm:$0xff]  }
  0x9c   :  { %3355 = vmatpush3.bf16.msra.mxu0 %v3704_v22  ;;  %v3750_v22 = vld [vmem:[%s4631_s1 + $0x578] sm:$0xff]  }
  0x9d   :  { %3356 = vmatprep.subr.bf16.mxu0 %v3706_v24  ;;  %3377 = vmatpush3.bf16.msra.mxu1 %v3705_v23  ;;  %v3751_v23 = vld [vmem:[%s4631_s1 + $0x5f8] sm:$0xff]  }
  0x9e   :  { %3378 = vmatprep.subr.bf16.mxu1 %v3707_v25  ;;  %v3752_v24 = vld [vmem:[%s4631_s1 + $0x538] sm:$0xff]  }
  0x9f   :  { %v3753_v25 = vld [vmem:[%s4631_s1 + $0x5b8] sm:$0xff]  }
  0xa0   :  { %3357 = vmatpush3.bf16.msra.mxu0 %v3708_v26  ;;  %v3754_v26 = vld [vmem:[%s4630_s0 + $0x28] ss:$48 sps:$4 sm:$0xff]  }
  0xa1   :  { %3379 = vmatpush3.bf16.msra.mxu1 %v3709_v27  ;;  %3386 = vmatprep.subr.bf16.mxu0 %v3722_v43  ;;  %v3756_v27 = vld [vmem:[%s4630_s0 + $0x88] ss:$48 sps:$4 sm:$0xff]   ;;  %v313_v31 = vrot.slane %v3754_v26, %v3928_v44  ;;  %v550_v43 = vrot.slane %v3765_v36, %v3928_v44  ;;  %v3488_v36 = vpack.c.bf16 %v2671_v34, %v2670_v33 }
  0xa2   :  { %3408 = vmatprep.subr.bf16.mxu1 %v3723_v49  ;;  %v327_v32 = vrot.slane %v3756_v27, %v3928_v44  ;;  %v2962_v44 = vld [vmem:[%s4632_s2] ss:$0 sm:$0xff]  ;;  %v2666_v27 = vld [vmem:[%s4633_s3 + $0x10] sm:$0xff] }
  0xa3   :  { %2531 = vmatmul.mubr.bf16.vlgmr.msra.gmra.mrb[16].mxu0 %v619_v59  ;;  %v554_v49 = vcombine.high %v536_v42, %v550_v43  ;;  %v553_v51 = vcombine.low %v536_v42, %v550_v43  ;;  %v3480_v29 = vpack.c.bf16 %v2667_v28, %v2666_v27 }
  0xa4   :  { %2572 = vmatmul.mubr.bf16.vlgmr.msra.gmra.mrb[16].mxu1 %v621_v62  ;;  %3387 = vmatpush3.bf16.msra.mxu0 %v3724_v54  ;;  %v336_v40 = vcombine.high %v313_v31, %v327_v32  ;;  %v335_v46 = vcombine.low %v313_v31, %v327_v32  ;;  %v2669_v31 = vld [vmem:[%s4633_s3 + $0x28] sm:$0xff] }
  0xa5   :  { %3409 = vmatpush3.bf16.msra.mxu1 %v3725_v57  ;;  %3388 = vmatprep.subr.bf16.mxu0 %v3726_v60  ;;  %v626_v54 = vpack.c.bf16 %v554_v49, %v338_v48  ;;  %v625_v55 = vpack.c.bf16 %v553_v51, %v337_v50  ;;  %v3484_v32 = vpack.c.bf16 %v2669_v31, %v2668_v30 }
  0xa6   :  { %3410 = vmatprep.subr.bf16.mxu1 %v3727_v63  ;;  %v624_v52 = vpack.c.bf16 %v552_v45, %v336_v40  ;;  %v623_v53 = vpack.c.bf16 %v551_v47, %v335_v46 }
  0xa7   :  { %2653 = vmatprep.mubr.bf16.mxu1 %v626_v54 }
  0xa8   :  { %3389 = vmatpush3.bf16.msra.mxu0 %v3728_v0  ;;  %2612 = vmatprep.mubr.bf16.mxu0 %v624_v52 }
  0xa9   :  { %3411 = vmatpush3.bf16.msra.mxu1 %v3729_v1  ;;  %3390 = vmatprep.subr.bf16.mxu0 %v3730_v2 }
  0xaa   :  { %3412 = vmatprep.subr.bf16.mxu1 %v3731_v3 }
  0xac   :  { %3391 = vmatpush3.bf16.msra.mxu0 %v3732_v4 }
  0xad   :  { %3413 = vmatpush3.bf16.msra.mxu1 %v3733_v5  ;;  %3392 = vmatprep.subr.bf16.mxu0 %v3734_v6 }
  0xae   :  { %3414 = vmatprep.subr.bf16.mxu1 %v3735_v7 }
  0xb0   :  { %3393 = vmatpush3.bf16.msra.mxu0 %v3736_v8  ;;  %v2664_v8 = vld [vmem:[%s4633_s3] sm:$0xff] }
  0xb1   :  { %3415 = vmatpush3.bf16.msra.mxu1 %v3737_v9  ;;  %3394 = vmatprep.subr.bf16.mxu0 %v3738_v10  ;;  %v2665_v9 = vld [vmem:[%s4633_s3 + $0x8] sm:$0xff] }
  0xb2   :  { %3416 = vmatprep.subr.bf16.mxu1 %v3739_v11  ;;  %v3476_v10 = vpack.c.bf16 %v2665_v9, %v2664_v8 }
  0xb4   :  { %3395 = vmatpush3.bf16.msra.mxu0 %v3740_v12 }
  0xb5   :  { %3417 = vmatpush3.bf16.msra.mxu1 %v3741_v13  ;;  %3396 = vmatprep.subr.bf16.mxu0 %v3742_v14 }
  0xb6   :  { %3418 = vmatprep.subr.bf16.mxu1 %v3743_v15 }
  0xb8   :  { %3397 = vmatpush3.bf16.msra.mxu0 %v3744_v16 }
  0xb9   :  { %3419 = vmatpush3.bf16.msra.mxu1 %v3745_v17  ;;  %3398 = vmatprep.subr.bf16.mxu0 %v3746_v18 }
  0xba   :  { %3420 = vmatprep.subr.bf16.mxu1 %v3747_v19 }
  0xbc   :  { %3399 = vmatpush3.bf16.msra.mxu0 %v3748_v20 }
  0xbd   :  { %3421 = vmatpush3.bf16.msra.mxu1 %v3749_v21  ;;  %3400 = vmatprep.subr.bf16.mxu0 %v3750_v22 }
  0xbe   :  { %3422 = vmatprep.subr.bf16.mxu1 %v3751_v23 }
  0xc0   :  { %3401 = vmatpush3.bf16.msra.mxu0 %v3752_v24 }
  0xc1   :  { %3423 = vmatpush3.bf16.msra.mxu1 %v3753_v25  ;;  %3477 = vmatprep.subr.bf16.mxu0 %v3476_v10 }
  0xc2   :  { %3493 = vmatprep.subr.bf16.mxu1 %v3492_v39 }
  0xc3   :  { %2613 = vmatmul.mubr.bf16.vlgmr.msra.gmra.mrb[20].mxu0 %v623_v53 }
  0xc4   :  { %2654 = vmatmul.mubr.bf16.vlgmr.msra.gmra.mrb[20].mxu1 %v625_v55  ;;  %3479 = vmatpush3.bf16.msra.mxu0 %v3476_v10 }
  0xc5   :  { %3481 = vmatprep.subr.bf16.mxu0 %v3480_v29  ;;  %3495 = vmatpush3.bf16.msra.mxu1 %v3492_v39 }
  0xc8   :  { %3483 = vmatpush3.bf16.msra.mxu0 %v3480_v29 }
  0xc9   :  { %3485 = vmatprep.subr.bf16.mxu0 %v3484_v32 }
  0xcc   :  { %3487 = vmatpush3.bf16.msra.mxu0 %v3484_v32 }
  0xcd   :  { %3489 = vmatprep.subr.bf16.mxu0 %v3488_v36 }
  0xd0   :  { %3491 = vmatpush3.bf16.msra.mxu0 %v3488_v36 }
  0xf6   :  { %v3182_v56 = vpop.f32.mrb[0].mxu0 }
  0xf7   :  { %v3204_v57 = vpop.f32.mrb[0].mxu1  ;;  %v3183_v58 = vpop.f32.mrb[1].mxu0 }
  0xf8   :  { %v3184_v59 = vadd.f32 %v3183_v58, %v3182_v56  ;;  %v3205_v60 = vpop.f32.mrb[1].mxu1  ;;  %v3185_v61 = vpop.f32.mrb[2].mxu0 }
  0xf9   :  { %v3206_v62 = vadd.f32 %v3205_v60, %v3204_v57  ;;  %v3207_v63 = vpop.f32.mrb[2].mxu1  ;;  %v3186_v0 = vpop.f32.mrb[3].mxu0 }
  0xfa   :  { %v2205_v1 = vadd.f32 %v3184_v59, %v2962_v44  ;;  %v3187_v2 = vadd.f32 %v3186_v0, %v3185_v61  ;;  %v3208_v3 = vpop.f32.mrb[3].mxu1 }
  0xfb   :  { %v3209_v4 = vadd.f32 %v3208_v3, %v3207_v63 }
  0xfc   :  { %v2246_v5 = vadd.f32 %v3206_v62, %v2205_v1  ;;  %v2208_v6 = vadd.f32 %v3187_v2, %v2962_v44 }
  0xfe   :  { %v2249_v7 = vadd.f32 %v3209_v4, %v2208_v6 }
 0x116   :  { %v3226_v11 = vpop.f32.mrb[4].mxu0 }
 0x117   :  { %v3248_v12 = vpop.f32.mrb[4].mxu1  ;;  %v3227_v13 = vpop.f32.mrb[5].mxu0 }
 0x118   :  { %v3228_v14 = vadd.f32 %v3227_v13, %v3226_v11  ;;  %v3249_v15 = vpop.f32.mrb[5].mxu1  ;;  %v3229_v16 = vpop.f32.mrb[6].mxu0 }
 0x119   :  { %v3250_v17 = vadd.f32 %v3249_v15, %v3248_v12  ;;  %v3251_v18 = vpop.f32.mrb[6].mxu1  ;;  %v3230_v19 = vpop.f32.mrb[7].mxu0 }
 0x11a   :  { %v2287_v20 = vadd.f32 %v3228_v14, %v2246_v5  ;;  %v3231_v21 = vadd.f32 %v3230_v19, %v3229_v16  ;;  %v3252_v22 = vpop.f32.mrb[7].mxu1 }
 0x11b   :  { %v3253_v23 = vadd.f32 %v3252_v22, %v3251_v18 }
 0x11c   :  { %v2328_v24 = vadd.f32 %v3250_v17, %v2287_v20  ;;  %v2290_v25 = vadd.f32 %v3231_v21, %v2249_v7 }
 0x11e   :  { %v2331_v26 = vadd.f32 %v3253_v23, %v2290_v25 }
 0x136   :  { %v3270_v40 = vpop.f32.mrb[8].mxu0 }
 0x137   :  { %v3292_v41 = vpop.f32.mrb[8].mxu1  ;;  %v3271_v42 = vpop.f32.mrb[9].mxu0 }
 0x138   :  { %v3272_v43 = vadd.f32 %v3271_v42, %v3270_v40  ;;  %v3293_v45 = vpop.f32.mrb[9].mxu1  ;;  %v3273_v46 = vpop.f32.mrb[10].mxu0 }
 0x139   :  { %v3294_v47 = vadd.f32 %v3293_v45, %v3292_v41  ;;  %v3295_v48 = vpop.f32.mrb[10].mxu1  ;;  %v3274_v49 = vpop.f32.mrb[11].mxu0  ;;  %v2766_v45 = vld [vmem:[%s4635_s5 + $0x18] sm:$0xff] }
 0x13a   :  { %v2369_v50 = vadd.f32 %v3272_v43, %v2328_v24  ;;  %v3275_v51 = vadd.f32 %v3274_v49, %v3273_v46  ;;  %v3296_v52 = vpop.f32.mrb[11].mxu1  ;;  %v2765_v43 = vld [vmem:[%s4635_s5 + $0x10] sm:$0xff] }
 0x13b   :  { %v3297_v53 = vadd.f32 %v3296_v52, %v3295_v48  ;;  %v3496_v46 = vpack.c.bf16 %v2766_v45, %v2765_v43 }
 0x13c   :  { %v2410_v54 = vadd.f32 %v3294_v47, %v2369_v50  ;;  %v2372_v55 = vadd.f32 %v3275_v51, %v2331_v26  ;;  %v3155_v47 = vld [vmem:[%s4634_s4] ss:$0 sm:$0xff] }
 0x13d   :  { %3497 = vmatprep.subr.bf16.mxu1 %v3496_v46 }
 0x13e   :  { %v2413_v56 = vadd.f32 %v3297_v53, %v2372_v55  ;;  %3499 = vmatpush3.bf16.msra.mxu1 %v3496_v46 }
 0x156   :  { %v3314_v57 = vpop.f32.mrb[12].mxu0 }
 0x157   :  { %v3315_v44 = vpop.f32.mrb[13].mxu0  ;;  %v3336_v58 = vpop.f32.mrb[12].mxu1 }
 0x158   :  { %v3316_v59 = vadd.f32 %v3315_v44, %v3314_v57  ;;  %v3317_v60 = vpop.f32.mrb[14].mxu0  ;;  %v3337_v61 = vpop.f32.mrb[13].mxu1  ;;  %v3158_v57 = vld [vmem:[%s4636_s6] ss:$0 sm:$0xff] }
 0x159   :  { %v3318_v62 = vpop.f32.mrb[15].mxu0  ;;  %v3338_v0 = vadd.f32 %v3337_v61, %v3336_v58  ;;  %v3339_v1 = vpop.f32.mrb[14].mxu1 }
 0x15a   :  { %v2451_v63 = vadd.f32 %v3316_v59, %v2410_v54  ;;  %v3319_v2 = vadd.f32 %v3318_v62, %v3317_v60  ;;  %v3340_v3 = vpop.f32.mrb[15].mxu1  ;;  %v3767_v54 = vmov 1966171168  }
 0x15b   :  { %v3341_v6 = vadd.f32 %v3340_v3, %v3339_v1  ;;  %v2860_v55 = vunpack.c.l.s4 %v3767_v54 }
 0x15c   :  { %v2492_v4 = vadd.f32 %v3338_v0, %v2451_v63  ;;  %v2454_v5 = vadd.f32 %v3319_v2, %v2413_v56 }
 0x15d   :  { %v2861_v56 = vunpack.c.0.s8 %v2860_v55 }
 0x15e   :  { %v2495_v7 = vadd.f32 %v3341_v6, %v2454_v5 }
 0x15f   :  { %v2864_v59 = vsub.s32 %v2861_v56, %v3904_v35 }
 0x176   :  { %v3358_v8 = vpop.f32.mrb[16].mxu0 }
 0x177   :  { %v3380_v9 = vpop.f32.mrb[16].mxu1  ;;  %v3359_v10 = vpop.f32.mrb[17].mxu0 }
 0x178   :  { %v3360_v11 = vadd.f32 %v3359_v10, %v3358_v8  ;;  %v3381_v12 = vpop.f32.mrb[17].mxu1  ;;  %v3361_v13 = vpop.f32.mrb[18].mxu0 }
 0x179   :  { %v3382_v14 = vadd.f32 %v3381_v12, %v3380_v9  ;;  %v3383_v15 = vpop.f32.mrb[18].mxu1  ;;  %v3362_v16 = vpop.f32.mrb[19].mxu0 }
 0x17a   :  { %v2533_v17 = vadd.f32 %v3360_v11, %v2492_v4  ;;  %v3363_v18 = vadd.f32 %v3362_v16, %v3361_v13  ;;  %v3384_v19 = vpop.f32.mrb[19].mxu1 }
 0x17b   :  { %v3385_v20 = vadd.f32 %v3384_v19, %v3383_v15 }
 0x17c   :  { %v2574_v21 = vadd.f32 %v3382_v14, %v2533_v17  ;;  %v2536_v22 = vadd.f32 %v3363_v18, %v2495_v7 }
 0x17e   :  { %v2577_v23 = vadd.f32 %v3385_v20, %v2536_v22 }
 0x196   :  { %v3402_v24 = vpop.f32.mrb[20].mxu0 }
 0x197   :  { %v3424_v25 = vpop.f32.mrb[20].mxu1  ;;  %v3403_v26 = vpop.f32.mrb[21].mxu0 }
 0x198   :  { %v3404_v27 = vadd.f32 %v3403_v26, %v3402_v24  ;;  %v3425_v28 = vpop.f32.mrb[21].mxu1  ;;  %v3405_v29 = vpop.f32.mrb[22].mxu0 }
 0x199   :  { %v3426_v30 = vadd.f32 %v3425_v28, %v3424_v25  ;;  %v3427_v31 = vpop.f32.mrb[22].mxu1  ;;  %v3406_v32 = vpop.f32.mrb[23].mxu0 }
 0x19a   :  { %v2615_v33 = vadd.f32 %v3404_v27, %v2574_v21  ;;  %v3407_v34 = vadd.f32 %v3406_v32, %v3405_v29  ;;  %v3428_v36 = vpop.f32.mrb[23].mxu1 }
 0x19b   :  { %v3429_v37 = vadd.f32 %v3428_v36, %v3427_v31 }
 0x19c   :  { %v2656_v38 = vadd.f32 %v3426_v30, %v2615_v33  ;;  %v2618_v39 = vadd.f32 %v3407_v34, %v2577_v23 }
 0x19e   :  { %v2662_v40 = vmax.f32 %v2656_v38, 0.0  ;;  %v2659_v41 = vadd.f32 %v3429_v37, %v2618_v39 }
 0x1a0   :  { %v2663_v42 = vmax.f32 %v2659_v41, 0.0  ;;  %3462 = vmatprep.mubr.msk.f32.mxu0 %vm2679_vm0, %v2662_v40 }
 0x1a2   :  { %3463 = vmatmul.mubr.msk.f32.vlgmr.msra.gmra.mrb[24].mxu0 %vm2679_vm0, %v2663_v42 }
 0x275   :  { %v3464_v48 = vpop.f32.mrb[24].mxu0 }
 0x276   :  { %v2758_v49 = vadd.f32 %v3464_v48, %v3155_v47  ;;  %v2752_v50 = vpop.f32.mrb[25].mxu0 }
 0x277   :  { %v2753_v51 = vadd.f32 %v3155_v47, %v2752_v50 }
 0x278   :  { %v2762_v53 = vmax.f32 %v2758_v49, 0.0 }
 0x279   :  { %v2761_v52 = vmax.f32 %v2753_v51, 0.0 }
 0x27b   :  { %3473 = vmatprep.mubr.msk.f32.mxu1 %vm2774_vm1, %v2761_v52 }
 0x27c   :  { %3474 = vmatmul.mubr.msk.f32.vlgmr.msra.gmra.mrb[24].mxu1 %vm2774_vm1, %v2762_v53 }
 0x34f   :  { %v3475_v44 = vpop.f32.mrb[24].mxu1 }
 0x350   :  { %v2853_v58 = vadd.f32 %v3475_v44, %v3158_v57  ;;  %v2847_v60 = vpop.f32.mrb[25].mxu1 }
 0x351   :  { %v2848_v61 = vadd.f32 %v3158_v57, %v2847_v60 }
 0x353   :  { %v2856_v62 = vpack.c.bf16 %v2853_v58, %v2848_v61 }
 0x355   :  { %v2865_v63 = vrot.slane %v2856_v62, %v2864_v59 }
 0x357   :  { %3162 = vst.sshfl [vmem:[#allocation2] sm:$0x1 pattern:$0x73625140] %v2865_v63 }
 0x35e   :  { %v2940_v0 = vld [vmem:[#allocation2] sm:$0x1] }
 0x35f   :  { %2941 = vst [vmem:[%s4637_s7] sm:$0x1] %v2940_v0 }

</bundles_post_ra>
